<compile_context>
chip_gen: v7x
topology: tpu7x:2x2x1
jax: 0.10.0
libtpu: 0.0.40
codegen_flags: <defaults>
</compile_context>

<pallas_src>
import functools
import math

import jax
import jax.numpy as jnp
from jax.experimental import pallas as pl
from jax.experimental.pallas import tpu as pltpu

SQRT2 = math.sqrt(2.0)
LN_EPS = 1e-12          # TransformerLayerNorm eps


def _round_up(x, m):
    return ((x + m - 1) // m) * m


def _tpu_vmem_capacity():
    try:
        return int(pltpu.get_tpu_info().vmem_capacity_bytes)
    except Exception:
        return 64 * 1024 * 1024   # conservative (v7x-sized) fallback


_PHYS_VMEM = _tpu_vmem_capacity()
# v5e/v6e (128 MiB physical VMEM): 96 MiB scoped limit, 512-row tiles.
# v7x (64 MiB physical VMEM): 48 MiB scoped limit, 256-row tiles.
VMEM_LIMIT = min((_PHYS_VMEM * 3) // 4, 112 * 1024 * 1024)
TM_TARGET = 512 if _PHYS_VMEM >= (96 << 20) else 256
KV_TARGET = 512          # flash-attention KV tile


def _gelu(x):
    # exact erf GELU, matching s3prl transformer.model.gelu
    return x * 0.5 * (1.0 + jax.lax.erf(x / SQRT2))


def _layernorm(y, gamma, beta, eps):
    # one-pass var = E[y^2] - mean^2 (one fewer full-tile reduction pass)
    mean = jnp.mean(y, axis=-1, keepdims=True)
    var = jnp.maximum(jnp.mean(y * y, axis=-1, keepdims=True) - mean * mean, 0.0)
    return (y - mean) * jax.lax.rsqrt(var + eps) * gamma + beta


def _row_tile(M):
    tm = min(M, TM_TARGET)
    assert M % tm == 0, f"row count {M} is not a multiple of the row tile {tm}"
    return tm


def _plan_seq_pad(B, S0):
    """Pad S so that (a) it is a sublane multiple, (b) B*S admits an MXU-shaped
    row tile (avoids the tm=8 cliff), (c) the flash KV axis tiles evenly."""
    S = _round_up(S0, 8)
    if B * S <= TM_TARGET:
        return S
    row_step = TM_TARGET // math.gcd(B, TM_TARGET)   # power of two <= TM_TARGET
    S = _round_up(S, row_step)
    if S > KV_TARGET:
        S = _round_up(S, KV_TARGET)                  # KV_TARGET multiple of row_step
    return S


# ----------------------------- Pallas kernels ------------------------------

def _linear_kernel(x_ref, w_ref, b_ref, *rest, activation, has_residual,
                   has_ln, eps):
    """Single-shot matmul (weight resident in VMEM) with fused bias / GELU /
    residual-add / LayerNorm epilogue.  Grid = (row_tiles,)."""
    idx = 0
    res_ref = g_ref = bb_ref = None
    if has_residual:
        res_ref = rest[idx]
        idx += 1
    if has_ln:
        g_ref, bb_ref = rest[idx], rest[idx + 1]
        idx += 2
    o_ref = rest[idx]

    y = jnp.dot(x_ref[...], w_ref[...],
                preferred_element_type=jnp.float32) + b_ref[...]
    if activation == "gelu":
        y = _gelu(y)
    if has_residual:
        y = y + res_ref[...].astype(jnp.float32)
    if has_ln:
        y = _layernorm(y, g_ref[...], bb_ref[...], eps)
    o_ref[...] = y.astype(o_ref.dtype)


def linear(x, w, b, *, activation=None, residual=None, ln=None,
           out_dtype=jnp.bfloat16):
    """y = epilogue(x @ w + b).  x:[M,K] bf16, w:[K,N] bf16 (resident), b:[N] f32."""
    M, K = x.shape
    N = w.shape[1]
    tm = _row_tile(M)

    in_specs = [
        pl.BlockSpec((tm, K), lambda i: (i, 0)),
        pl.BlockSpec((K, N), lambda i: (0, 0)),     # resident weight, one DMA
        pl.BlockSpec((1, N), lambda i: (0, 0)),
    ]
    args = [x, w, b.reshape(1, N)]
    if residual is not None:
        in_specs.append(pl.BlockSpec((tm, N), lambda i: (i, 0)))
        args.append(residual)
    if ln is not None:
        gamma, beta = ln
        in_specs += [pl.BlockSpec((1, N), lambda i: (0, 0)),
                     pl.BlockSpec((1, N), lambda i: (0, 0))]
        args += [gamma.reshape(1, N), beta.reshape(1, N)]

    return pl.pallas_call(
        functools.partial(_linear_kernel, activation=activation,
                          has_residual=residual is not None,
                          has_ln=ln is not None, eps=LN_EPS),
        out_shape=jax.ShapeDtypeStruct((M, N), out_dtype),
        grid=(M // tm,),
        in_specs=in_specs,
        out_specs=pl.BlockSpec((tm, N), lambda i: (i, 0)),
        compiler_params=pltpu.CompilerParams(
            dimension_semantics=("parallel",),
            vmem_limit_bytes=VMEM_LIMIT),
    )(*args)


def _qkv_kernel(x_ref, w_ref, b_ref, q_ref, k_ref, v_ref, *, hidden):
    """Fused QKV projection: one matmul against a resident [K, 3H] weight."""
    y = jnp.dot(x_ref[...], w_ref[...],
                preferred_element_type=jnp.float32) + b_ref[...]
    q_ref[...] = y[:, :hidden].astype(q_ref.dtype)
    k_ref[...] = y[:, hidden:2 * hidden].astype(k_ref.dtype)
    v_ref[...] = y[:, 2 * hidden:].astype(v_ref.dtype)


def qkv_projection(x, w_qkv, b_qkv, hidden):
    """x:[M,H] -> (q, k, v) each [M, H] bf16, via a single fused matmul."""
    M, K = x.shape
    N = w_qkv.shape[1]          # 3 * hidden
    tm = _row_tile(M)
    out_sd = jax.ShapeDtypeStruct((M, hidden), jnp.bfloat16)
    out_spec = pl.BlockSpec((tm, hidden), lambda i: (i, 0))
    return pl.pallas_call(
        functools.partial(_qkv_kernel, hidden=hidden),
        out_shape=(out_sd, out_sd, out_sd),
        grid=(M // tm,),
        in_specs=[
            pl.BlockSpec((tm, K), lambda i: (i, 0)),
            pl.BlockSpec((K, N), lambda i: (0, 0)),   # resident weight
            pl.BlockSpec((1, N), lambda i: (0, 0)),
        ],
        out_specs=(out_spec, out_spec, out_spec),
        compiler_params=pltpu.CompilerParams(
            dimension_semantics=("parallel",),
            vmem_limit_bytes=VMEM_LIMIT),
    )(x, w_qkv, b_qkv.reshape(1, N))


def _flash_attn_kernel(q_ref, k_ref, v_ref, bias_ref, o_ref,
                       m_ref, l_ref, acc_ref):
    """Flash-style attention for one (batch, head): online softmax over KV tiles.

    The 1/sqrt(dh) scale is folded into the Q projection weights, so the score
    is just Q @ K^T + bias.  All softmax math is f32; the normalization uses
    the approximate EUP reciprocal.
    """
    kv = pl.program_id(1)

    @pl.when(kv == 0)
    def _():
        m_ref[...] = jnp.full_like(m_ref, -jnp.inf)
        l_ref[...] = jnp.zeros_like(l_ref)
        acc_ref[...] = jnp.zeros_like(acc_ref)

    q = q_ref[0]                # [S, dh] bf16
    k = k_ref[0]                # [tkv, dh] bf16
    v = v_ref[0]                # [tkv, dh] bf16
    s = jax.lax.dot_general(q, k, (((1,), (1,)), ((), ())),
                            preferred_element_type=jnp.float32) + bias_ref[0]
    m_prev = m_ref[...]
    m_new = jnp.maximum(m_prev, jnp.max(s, axis=-1, keepdims=True))
    alpha = jnp.exp(m_prev - m_new)
    p = jnp.exp(s - m_new)
    l_ref[...] = alpha * l_ref[...] + jnp.sum(p, axis=-1, keepdims=True)
    acc_ref[...] = alpha * acc_ref[...] + jnp.dot(p.astype(v.dtype), v,
                                                  preferred_element_type=jnp.float32)
    m_ref[...] = m_new

    @pl.when(kv == pl.num_programs(1) - 1)
    def _():
        o_ref[0] = (acc_ref[...] *
                    pl.reciprocal(l_ref[...], approx=True)).astype(o_ref.dtype)


def multihead_attention(q, k, v, attn_bias_bh):
    """q,k,v: [B*nh, S, dh] bf16; attn_bias_bh: [B*nh, 1, S] f32 -> [B*nh, S, dh] bf16."""
    BH, S, dh = q.shape
    tkv = S if S <= KV_TARGET else KV_TARGET
    assert S % tkv == 0
    q_spec = pl.BlockSpec((1, S, dh), lambda i, kv: (i, 0, 0))
    kv_spec = pl.BlockSpec((1, tkv, dh), lambda i, kv: (i, kv, 0))
    return pl.pallas_call(
        _flash_attn_kernel,
        out_shape=jax.ShapeDtypeStruct((BH, S, dh), jnp.bfloat16),
        grid=(BH, S // tkv),
        in_specs=[q_spec, kv_spec, kv_spec,
                  pl.BlockSpec((1, 1, tkv), lambda i, kv: (i, 0, kv))],
        out_specs=q_spec,
        scratch_shapes=[pltpu.VMEM((S, 1), jnp.float32),
                        pltpu.VMEM((S, 1), jnp.float32),
                        pltpu.VMEM((S, dh), jnp.float32)],
        compiler_params=pltpu.CompilerParams(
            dimension_semantics=("parallel", "arbitrary"),
            vmem_limit_bytes=VMEM_LIMIT),
    )(q, k, v, attn_bias_bh)


def _spec_out_loss_kernel(x_ref, w_ref, b_ref, t_ref, m_ref, o_ref, s_ref, c_ref):
    """Final output projection with the masked L1 loss fused into the epilogue."""
    @pl.when(pl.program_id(0) == 0)
    def _():
        s_ref[...] = jnp.zeros_like(s_ref)
        c_ref[...] = jnp.zeros_like(c_ref)

    y = jnp.dot(x_ref[...], w_ref[...],
                preferred_element_type=jnp.float32) + b_ref[...]
    o_ref[...] = y                                   # f32, lane-dense (padded N)
    mask = m_ref[...].astype(jnp.float32)
    s_ref[0, 0] += jnp.sum(jnp.abs(y - t_ref[...]) * mask)
    c_ref[0, 0] += jnp.sum(mask)


def spec_head_output_with_loss(x, w, b, target, mask):
    """pred = x @ w + b (f32), plus masked-L1 sum / mask count accumulators."""
    M, K = x.shape
    N = w.shape[1]
    tm = _row_tile(M)
    row_spec = pl.BlockSpec((tm, N), lambda i: (i, 0))
    acc_spec = pl.BlockSpec((1, 1), lambda i: (0, 0))
    pred, s, c = pl.pallas_call(
        _spec_out_loss_kernel,
        out_shape=(jax.ShapeDtypeStruct((M, N), jnp.float32),
                   jax.ShapeDtypeStruct((1, 1), jnp.float32),
                   jax.ShapeDtypeStruct((1, 1), jnp.float32)),
        grid=(M // tm,),
        in_specs=[pl.BlockSpec((tm, K), lambda i: (i, 0)),
                  pl.BlockSpec((K, N), lambda i: (0, 0)),   # resident weight
                  pl.BlockSpec((1, N), lambda i: (0, 0)),
                  row_spec, row_spec],
        out_specs=(row_spec, acc_spec, acc_spec),
        compiler_params=pltpu.CompilerParams(
            # row axis is the reduction axis of the (1,1) loss accumulators
            dimension_semantics=("arbitrary",),
            vmem_limit_bytes=VMEM_LIMIT),
    )(x, w, b.reshape(1, N), target, mask)
    return pred, s[0, 0], c[0, 0]


# --------------------------- model (JAX glue) ------------------------------

def init_params(key, input_dim, hidden, heads, inter, layers, output_dim,
                init_range=0.02):
    """Matmul weights stored bf16 (MXU operands); biases / LN params f32.
    The Q columns of the fused QKV weight carry the 1/sqrt(dh) softmax scale;
    the output projection is zero-padded to a 128-lane multiple."""
    assert hidden % heads == 0
    dh = hidden // heads
    out_pad = _round_up(output_dim, 128)
    n_w = 3 + 4 * layers
    keys = iter(jax.random.split(key, n_w))

    def w32(shape):
        return init_range * jax.random.normal(next(keys), shape, jnp.float32)

    def zeros(n):
        return jnp.zeros((n,), jnp.float32)

    def ones(n):
        return jnp.ones((n,), jnp.float32)

    params = {
        # input representation (spec_transform + LayerNorm)
        "in_w": w32((input_dim, hidden)).astype(jnp.bfloat16), "in_b": zeros(hidden),
        "in_ln_g": ones(hidden), "in_ln_b": zeros(hidden),
        "layers": [],
        # SpecPredictionHead
        "sh_w": w32((hidden, hidden)).astype(jnp.bfloat16), "sh_b": zeros(hidden),
        "sh_ln_g": ones(hidden), "sh_ln_b": zeros(hidden),
        "out_w": jnp.pad(w32((hidden, output_dim)),
                         ((0, 0), (0, out_pad - output_dim))).astype(jnp.bfloat16),
        "out_b": zeros(out_pad),
        "num_heads": heads,
        "output_dim": output_dim,
    }
    scale = 1.0 / math.sqrt(dh)
    for _ in range(layers):
        qkv_w = w32((hidden, 3 * hidden))
        # fold the softmax scale into Q (free at runtime); do the same when
        # loading a PyTorch checkpoint.
        qkv_w = qkv_w.at[:, :hidden].multiply(scale)
        params["layers"].append({
            "qkv_w": qkv_w.astype(jnp.bfloat16), "qkv_b": zeros(3 * hidden),
            "ao_w": w32((hidden, hidden)).astype(jnp.bfloat16), "ao_b": zeros(hidden),
            "ln1_g": ones(hidden), "ln1_b": zeros(hidden),
            "i_w": w32((hidden, inter)).astype(jnp.bfloat16), "i_b": zeros(inter),
            "o_w": w32((inter, hidden)).astype(jnp.bfloat16), "o_b": zeros(hidden),
            "ln2_g": ones(hidden), "ln2_b": zeros(hidden),
        })
    return params


def mockingjay_forward(params, spec_masked, pos_enc, mask_label, attn_mask,
                       spec_target):
    """Equivalent of UpstreamPretrainExpert.forward -> (loss, pred_spec)."""
    B, S0, D_in = spec_masked.shape
    H = params["in_w"].shape[1]
    nh = params["num_heads"]
    dh = H // nh
    D_out = params["output_dim"]
    D_pad = params["out_w"].shape[1]

    # pos_enc 2D -> 3D expand (as in the PyTorch forward)
    if pos_enc.ndim == 2:
        pos_enc = jnp.broadcast_to(pos_enc[None], (B, S0, H))

    # Pad the sequence so tiles are MXU-shaped; padded keys are masked by the
    # attention bias and padded frames carry mask==0 so the loss is unchanged.
    S = _plan_seq_pad(B, S0)
    pad = S - S0
    attn_mask = attn_mask.astype(jnp.float32)
    if pad:
        pad3 = ((0, 0), (0, pad), (0, 0))
        spec_masked = jnp.pad(spec_masked, pad3)
        spec_target = jnp.pad(spec_target, pad3)
        mask_label = jnp.pad(mask_label, pad3)
        pos_enc = jnp.pad(pos_enc, pad3)
        attn_mask = jnp.pad(attn_mask, ((0, 0), (0, pad)))

    M = B * S
    x = spec_masked.reshape(M, D_in).astype(jnp.bfloat16)
    pos = pos_enc.reshape(M, H).astype(jnp.bfloat16)

    # ---- TransformerInputRepresentations: LN(spec_transform(x) + pos_enc) ----
    x = linear(x, params["in_w"], params["in_b"], residual=pos,
               ln=(params["in_ln_g"], params["in_ln_b"]))

    # extended attention mask: (1 - mask) * -10000, pre-expanded per (batch, head)
    attn_bias = ((1.0 - attn_mask) * -10000.0).reshape(B, 1, S)
    attn_bias_bh = jnp.repeat(attn_bias, nh, axis=0)     # [B*nh, 1, S], tiny

    def split_heads(t):       # [M, H] -> [B*nh, S, dh]  (layout plumbing via XLA)
        return t.reshape(B, S, nh, dh).transpose(0, 2, 1, 3).reshape(B * nh, S, dh)

    # ---- Transformer encoder layers ----
    for lyr in params["layers"]:
        q, k, v = qkv_projection(x, lyr["qkv_w"], lyr["qkv_b"], H)
        ctx = multihead_attention(split_heads(q), split_heads(k), split_heads(v),
                                  attn_bias_bh)
        ctx = ctx.reshape(B, nh, S, dh).transpose(0, 2, 1, 3).reshape(M, H)
        # self-output: LN(dense(ctx) + x)   (residual + LN fused in epilogue)
        x = linear(ctx, lyr["ao_w"], lyr["ao_b"],
                   residual=x, ln=(lyr["ln1_g"], lyr["ln1_b"]))
        # FFN: LN(dense(gelu(dense(x))) + x)
        h1 = linear(x, lyr["i_w"], lyr["i_b"], activation="gelu")
        x = linear(h1, lyr["o_w"], lyr["o_b"],
                   residual=x, ln=(lyr["ln2_g"], lyr["ln2_b"]))

    # ---- SpecPredictionHead: LN(gelu(dense(x))), then output projection with
    #      the masked L1 loss fused into its epilogue ----
    h = linear(x, params["sh_w"], params["sh_b"], activation="gelu",
               ln=(params["sh_ln_g"], params["sh_ln_b"]))

    col_pad = D_pad - D_out
    target = jnp.pad(spec_target.astype(jnp.float32),
                     ((0, 0), (0, 0), (0, col_pad))).reshape(M, D_pad)
    mask = jnp.pad(mask_label.astype(jnp.bfloat16),
                   ((0, 0), (0, 0), (0, col_pad))).reshape(M, D_pad)
    pred, loss_sum, mask_cnt = spec_head_output_with_loss(
        h, params["out_w"], params["out_b"], target, mask)

    pred_spec = pred.reshape(B, S, D_pad)[:, :S0, :D_out]
    loss = loss_sum / jnp.maximum(mask_cnt, 1.0)   # guard: PyTorch asserts mask.sum()>0
    return loss, pred_spec


def sinusoid_pos_enc(seq_len, hidden):
    """fast_position_encoding equivalent: [seq_len, hidden] sinusoid table."""
    pos = jnp.arange(seq_len, dtype=jnp.float32)[:, None]
    i = jnp.arange(hidden, dtype=jnp.float32)[None, :]
    angle = pos / jnp.power(10000.0, (2.0 * jnp.floor(i / 2.0)) / hidden)
    even = (jnp.arange(hidden) % 2) == 0
    return jnp.where(even[None, :], jnp.sin(angle), jnp.cos(angle))


# --------------------------------- main -------------------------------------

if __name__ == "__main__":
    B, S = 2, 8
    INPUT_DIM = 16
    HIDDEN = 32
    HEADS = 4
    INTER = 64
    LAYERS = 2
    OUTPUT_DIM = INPUT_DIM  # output_dim=None -> input_dim in the PyTorch module

    key = jax.random.PRNGKey(0)
    k_param, k_data = jax.random.split(key)

    params = init_params(k_param, INPUT_DIM, HIDDEN, HEADS, INTER, LAYERS,
                         OUTPUT_DIM)

    # data = [spec_masked, pos_enc, mask_label, attn_mask, spec_target]
    spec_target = jax.random.normal(k_data, (B, S, INPUT_DIM), jnp.float32)
    mask_label = jnp.zeros((B, S, INPUT_DIM), jnp.bool_).at[:, 2:4, :].set(True)
    spec_masked = jnp.where(mask_label, 0.0, spec_target)       # MAM-style zero mask
    attn_mask = jnp.ones((B, S), jnp.float32).at[1, -2:].set(0.0)  # padded tail
    pos_enc = sinusoid_pos_enc(S, HIDDEN)                       # 2D -> expanded inside

    loss, pred_spec = mockingjay_forward(params, spec_masked, pos_enc,
                                         mask_label, attn_mask, spec_target)
    jax.block_until_ready((loss, pred_spec))
    assert pred_spec.shape == (B, S, OUTPUT_DIM)
    assert jnp.isfinite(loss)
    print("KERNEL_OK")
</pallas_src>

<mosaic_0001>
module attributes {stable_mosaic.version = 11 : i64} {
  func.func @_linear_kernel(%arg0: i32, %arg1: memref<16x16xbf16, #tpu.memory_space<vmem>>, %arg2: memref<16x32xbf16, #tpu.memory_space<vmem>>, %arg3: memref<1x32xf32, #tpu.memory_space<vmem>>, %arg4: memref<16x32xbf16, #tpu.memory_space<vmem>>, %arg5: memref<1x32xf32, #tpu.memory_space<vmem>>, %arg6: memref<1x32xf32, #tpu.memory_space<vmem>>, %arg7: memref<16x32xbf16, #tpu.memory_space<vmem>>) attributes {dimension_semantics = [#tpu.dimension_semantics<parallel>], iteration_bounds = array<i64: 1>, scalar_prefetch = 0 : i64, scratch_operands = 0 : i64, tpu.core_type = #tpu.core_type<tc>, window_params = [{transform_indices = @transform_0, window_bounds = array<i64: 16, 16>}, {pipeline_mode = #tpu.pipeline_mode<synchronous>, transform_indices = @transform_1, window_bounds = array<i64: 16, 32>}, {pipeline_mode = #tpu.pipeline_mode<synchronous>, transform_indices = @transform_2, window_bounds = array<i64: 1, 32>}, {transform_indices = @transform_3, window_bounds = array<i64: 16, 32>}, {pipeline_mode = #tpu.pipeline_mode<synchronous>, transform_indices = @transform_4, window_bounds = array<i64: 1, 32>}, {pipeline_mode = #tpu.pipeline_mode<synchronous>, transform_indices = @transform_5, window_bounds = array<i64: 1, 32>}, {transform_indices = @transform_6, window_bounds = array<i64: 16, 32>}]} {
    %c0 = arith.constant 0 : index
    %c0_0 = arith.constant 0 : index
    %0 = vector.load %arg1[%c0, %c0_0] : memref<16x16xbf16, #tpu.memory_space<vmem>>, vector<16x16xbf16>
    %c0_1 = arith.constant 0 : index
    %c0_2 = arith.constant 0 : index
    %1 = vector.load %arg2[%c0_1, %c0_2] : memref<16x32xbf16, #tpu.memory_space<vmem>>, vector<16x32xbf16>
    %cst = arith.constant dense<0.000000e+00> : vector<16x32xf32>
    %2 = tpu.matmul %0, %1, %cst {dimension_numbers = #tpu.dot_dimension_numbers<[1], [0], [0], [1], [0, 0, 1, 1], [], []>} : vector<16x16xbf16>, vector<16x32xbf16>, vector<16x32xf32> -> vector<16x32xf32>
    %c0_3 = arith.constant 0 : index
    %c0_4 = arith.constant 0 : index
    %3 = vector.load %arg3[%c0_3, %c0_4] : memref<1x32xf32, #tpu.memory_space<vmem>>, vector<1x32xf32>
    %4 = vector.broadcast %3 : vector<1x32xf32> to vector<16x32xf32>
    %5 = arith.addf %2, %4 : vector<16x32xf32>
    %c0_5 = arith.constant 0 : index
    %c0_6 = arith.constant 0 : index
    %6 = vector.load %arg4[%c0_5, %c0_6] : memref<16x32xbf16, #tpu.memory_space<vmem>>, vector<16x32xbf16>
    %7 = arith.extf %6 : vector<16x32xbf16> to vector<16x32xf32>
    %8 = arith.addf %5, %7 : vector<16x32xf32>
    %c0_7 = arith.constant 0 : index
    %c0_8 = arith.constant 0 : index
    %9 = vector.load %arg5[%c0_7, %c0_8] : memref<1x32xf32, #tpu.memory_space<vmem>>, vector<1x32xf32>
    %c0_9 = arith.constant 0 : index
    %c0_10 = arith.constant 0 : index
    %10 = vector.load %arg6[%c0_9, %c0_10] : memref<1x32xf32, #tpu.memory_space<vmem>>, vector<1x32xf32>
    %cst_11 = arith.constant dense<0.000000e+00> : vector<16xf32>
    %11 = vector.multi_reduction <add>, %8, %cst_11 [1] : vector<16x32xf32> to vector<16xf32>
    %12 = vector.shape_cast %11 : vector<16xf32> to vector<16x1xf32>
    %cst_12 = arith.constant 3.200000e+01 : f32
    %13 = vector.broadcast %cst_12 : f32 to vector<16x1xf32>
    %14 = arith.divf %12, %13 : vector<16x1xf32>
    %15 = arith.mulf %8, %8 : vector<16x32xf32>
    %cst_13 = arith.constant dense<0.000000e+00> : vector<16xf32>
    %16 = vector.multi_reduction <add>, %15, %cst_13 [1] : vector<16x32xf32> to vector<16xf32>
    %17 = vector.shape_cast %16 : vector<16xf32> to vector<16x1xf32>
    %cst_14 = arith.constant 3.200000e+01 : f32
    %18 = vector.broadcast %cst_14 : f32 to vector<16x1xf32>
    %19 = arith.divf %17, %18 : vector<16x1xf32>
    %20 = arith.mulf %14, %14 : vector<16x1xf32>
    %21 = arith.subf %19, %20 : vector<16x1xf32>
    %cst_15 = arith.constant 0.000000e+00 : f32
    %22 = vector.broadcast %cst_15 : f32 to vector<16x1xf32>
    %23 = arith.maximumf %21, %22 : vector<16x1xf32>
    %24 = vector.broadcast %14 : vector<16x1xf32> to vector<16x32xf32>
    %25 = arith.subf %8, %24 : vector<16x32xf32>
    %cst_16 = arith.constant 9.99999996E-13 : f32
    %26 = vector.broadcast %cst_16 : f32 to vector<16x1xf32>
    %27 = arith.addf %23, %26 : vector<16x1xf32>
    %28 = math.rsqrt %27 : vector<16x1xf32>
    %29 = vector.broadcast %28 : vector<16x1xf32> to vector<16x32xf32>
    %30 = arith.mulf %25, %29 : vector<16x32xf32>
    %31 = vector.broadcast %9 : vector<1x32xf32> to vector<16x32xf32>
    %32 = arith.mulf %30, %31 : vector<16x32xf32>
    %33 = vector.broadcast %10 : vector<1x32xf32> to vector<16x32xf32>
    %34 = arith.addf %32, %33 : vector<16x32xf32>
    %35 = arith.truncf %34 : vector<16x32xf32> to vector<16x32xbf16>
    %c0_17 = arith.constant 0 : index
    %c0_18 = arith.constant 0 : index
    %36 = vector.load %arg7[%c0_17, %c0_18] : memref<16x32xbf16, #tpu.memory_space<vmem>>, vector<16x32xbf16>
    tpu.vector_store %arg7[%c0_17, %c0_18], %35 {strides = array<i32>} : memref<16x32xbf16, #tpu.memory_space<vmem>>, vector<16x32xbf16>,
    return
  }
  func.func @transform_0(%arg0: i32) -> (i32, i32) {
    %c0_i32 = arith.constant 0 : i32
    %c0_i32_0 = arith.constant 0 : i32
    return %arg0, %c0_i32 : i32, i32
  }
  func.func @transform_1(%arg0: i32) -> (i32, i32) {
    %c0_i32 = arith.constant 0 : i32
    %c0_i32_0 = arith.constant 0 : i32
    %c0_i32_1 = arith.constant 0 : i32
    return %c0_i32, %c0_i32_0 : i32, i32
  }
  func.func @transform_2(%arg0: i32) -> (i32, i32) {
    %c0_i32 = arith.constant 0 : i32
    %c0_i32_0 = arith.constant 0 : i32
    %c0_i32_1 = arith.constant 0 : i32
    return %c0_i32, %c0_i32_0 : i32, i32
  }
  func.func @transform_3(%arg0: i32) -> (i32, i32) {
    %c0_i32 = arith.constant 0 : i32
    %c0_i32_0 = arith.constant 0 : i32
    return %arg0, %c0_i32 : i32, i32
  }
  func.func @transform_4(%arg0: i32) -> (i32, i32) {
    %c0_i32 = arith.constant 0 : i32
    %c0_i32_0 = arith.constant 0 : i32
    %c0_i32_1 = arith.constant 0 : i32
    return %c0_i32, %c0_i32_0 : i32, i32
  }
  func.func @transform_5(%arg0: i32) -> (i32, i32) {
    %c0_i32 = arith.constant 0 : i32
    %c0_i32_0 = arith.constant 0 : i32
    %c0_i32_1 = arith.constant 0 : i32
    return %c0_i32, %c0_i32_0 : i32, i32
  }
  func.func @transform_6(%arg0: i32) -> (i32, i32) {
    %c0_i32 = arith.constant 0 : i32
    %c0_i32_0 = arith.constant 0 : i32
    return %arg0, %c0_i32 : i32, i32
  }
}

</mosaic_0001>

<bundles_post_ra>
// kernel: tpu_custom_call.1
= control target key start
LH: loop header
LB: loop body
LE: loop exit
PB: predicated region body
PF: predicated region fallthrough
CT: control target
= control target key end

     0   :  { %11 = vsyncpa [#allocation3], 0  ;;  %s413_s0 = inlined_call_operand.hbm [shape: bf16[16,16], index: 0, kind: input, shape index: {}]   ;;  %s414_s1 = inlined_call_operand.hbm [shape: bf16[16,32], index: 1, kind: input, shape index: {}]   ;;  %s415_s2 = inlined_call_operand.vmem [shape: f32[1,32], index: 2, kind: input, shape index: {}]   ;;  %s416_s3 = inlined_call_operand.vmem [shape: bf16[16,32], index: 3, kind: input, shape index: {}]   ;;  %s417_s4 = inlined_call_operand.vmem [shape: f32[1,32], index: 4, kind: input, shape index: {}]   ;;  %s418_s5 = inlined_call_operand.vmem [shape: f32[1,32], index: 5, kind: input, shape index: {}]   ;;  %s419_s6 = inlined_call_operand.hbm [shape: bf16[16,32], index: 6, kind: output, shape index: {}]  }
   0x1   :  { %12 = vsyncpa [#allocation6], 0 }
   0x2   :  { %13 = vsyncpa [#allocation4], 0  ;;  %s314_s21 = smov [#allocation2]   ;;  %s242_s25 = scalar_lea.hbm %s413_s0, 128 }
   0x3   :  { %s19_s22 = sshll.u32 %s314_s21, 4  ;;  %p243_p0 = scmp.ne.s32.totalorder %s413_s0, %s242_s25  ;;  %s20_s22 = int_to_ptr.vmem [resolvable:$true] %s19_s22 }
   0x4   :  { %p246_p1 = scmp.lt.u32.totalorder %s242_s25, %s413_s0 }
   0x6   :  { %p248_p2 = pnand %p246_p1, %p243_p0 }
   0x8   :  { %251 = shalt.err (!%p248_p2)
}
   0x9   :  { %s252_s30 = scalar_lea.vmem %s20_s22, 128  ;;  %p257_p4 = scmp.lt.s32.totalorder %s20_s22, %s20_s22 }
   0xa   :  { %p253_p3 = scmp.ne.s32.totalorder %s20_s22, %s252_s30  ;;  %p258_p5 = scmp.lt.s32.totalorder %s252_s30, %s252_s30 }
   0xc   :  { %p259_p6 = por %p258_p5, %p257_p4 }
   0xe   :  { %p260_p7 = pnand %p259_p6, %p253_p3 }
  0x10   :  { %263 = shalt.err (!%p260_p7)
}
  0x11   :  { %s315_s7 = smov 64   ;;  %s316_s8 = smov 4  }
  0x12   :  { %25 = dma.hbm_to_vmem [thread:$0]  %s413_s0, 128, %s20_s22, [#allocation3], %s315_s7, %s315_s7, %s316_s8  }
  0x13   :  { %s317_s11 = smov [#allocation5]   ;;  %s264_s15 = scalar_lea.hbm %s414_s1, 128 }
  0x14   :  { %s31_s12 = sshll.u32 %s317_s11, 4  ;;  %p265_p8 = scmp.ne.s32.totalorder %s414_s1, %s264_s15  ;;  %s32_s12 = int_to_ptr.vmem [resolvable:$true] %s31_s12 }
  0x15   :  { %p268_p9 = scmp.lt.u32.totalorder %s264_s15, %s414_s1 }
  0x17   :  { %p270_p10 = pnand %p268_p9, %p265_p8 }
  0x19   :  { %273 = shalt.err (!%p270_p10)
}
  0x1a   :  { %s274_s20 = scalar_lea.vmem %s32_s12, 128  ;;  %p279_p12 = scmp.lt.s32.totalorder %s32_s12, %s32_s12 }
  0x1b   :  { %p275_p11 = scmp.ne.s32.totalorder %s32_s12, %s274_s20  ;;  %p280_p13 = scmp.lt.s32.totalorder %s274_s20, %s274_s20 }
  0x1d   :  { %p281_p0 = por %p280_p13, %p279_p12 }
  0x1f   :  { %p282_p1 = pnand %p281_p0, %p275_p11 }
  0x21   :  { %285 = shalt.err (!%p282_p1)
}
  0x22   :  { %37 = dma.hbm_to_vmem [thread:$0]  %s414_s1, 128, %s32_s12, [#allocation6], %s315_s7, %s315_s7, %s316_s8  }
  0x23   :  { %308 = dma.done.wait [#allocation3], 128  }
  0x24   :  { %309 = vsyncadd [#allocation3], 4294967168 }
  0x25   :  { %310 = dma.done.wait [#allocation6], 128  }
  0x26   :  { %311 = vsyncadd [#allocation6], 4294967168  ;;  %v318_v0 = vmov 0.0   ;;  %vm319_vm0 = vmmov 0   ;;  %v236_v1 = vld [vmem:[#allocation5] sm:$0xff]   ;;  %v237_v2 = vld [vmem:[#allocation2] sm:$0xff]  }
  0x27   :  { %223 = vmatprep.subr.bf16.mxu0 %v318_v0  ;;  %225 = vmatprep.mubr.msk.bf16.mxu0 %vm319_vm0, %v318_v0  ;;  %vm75_vm1 = vcmask 130048   ;;  %v218_v3 = vld [vmem:[%s416_s3] sm:$0xff]   ;;  %vm128_vm2 = vcmask 261120   ;;  %vm186_vm3 = vcmask 257024   ;;  %s320_s27 = smov [#allocation7]  }
  0x28   :  { %224 = vmatpush3.bf16.msra.mxu0 %v236_v1  ;;  %v207_v4 = vld [vmem:[%s415_s2] ss:$0 sm:$0xff]  ;;  %v219_v5 = vunpack.c.l.bf16 %v218_v3  ;;  %v220_v9 = vunpack.c.h.bf16 %v218_v3  ;;  %s194_s28 = sshll.u32 %s320_s27, 4  ;;  %s195_s28 = int_to_ptr.vmem [resolvable:$true] %s194_s28 }
  0x29   :  { %v211_v39 = vld [vmem:[%s417_s4] ss:$0 sm:$0xff]  ;;  %s286_s4 = scalar_lea.vmem %s195_s28, 128  ;;  %p291_p3 = scmp.lt.s32.totalorder %s195_s28, %s195_s28 }
  0x2a   :  { %v212_v41 = vld [vmem:[%s418_s5] ss:$0 sm:$0xff]  ;;  %p287_p2 = scmp.ne.s32.totalorder %s195_s28, %s286_s4  ;;  %p292_p4 = scmp.lt.s32.totalorder %s286_s4, %s286_s4 }
  0x2b   :  { %226 = vmatmul.mubr.msk.bf16.vlgmr.msra.gmra.mrb[0].mxu0 %vm75_vm1, %v237_v2 }
  0x2c   :  { %p293_p5 = por %p292_p4, %p291_p3 }
  0x2e   :  { %p294_p6 = pnand %p293_p5, %p287_p2 }
  0xfe   :  { %v113_v6 = vpop.f32.mrb[0].mxu0 }
  0xff   :  { %v114_v7 = vadd.f32 %v207_v4, %v113_v6  ;;  %v227_v8 = vpop.f32.mrb[1].mxu0 }
 0x100   :  { %v116_v10 = vpop.f32.mrb[2].mxu0 }
 0x101   :  { %v124_v11 = vadd.f32 %v219_v5, %v114_v7  ;;  %v117_v12 = vadd.f32 %v207_v4, %v116_v10  ;;  %v228_v13 = vpop.f32.mrb[3].mxu0 }
 0x103   :  { %v125_v14 = vadd.f32 %v220_v9, %v117_v12  ;;  %v129_v15 = vsel %vm128_vm2, %v124_v11, 0.0  ;;  %v138_v16 = vmul.f32 %v124_v11, %v124_v11 }
 0x104   :  { %130 = vadd.xlane.f32.xlu0 %v129_v15 }
 0x105   :  { %v140_v17 = vsel %vm128_vm2, %v138_v16, 0.0  ;;  %v139_v18 = vmul.f32 %v125_v14, %v125_v14  ;;  %v132_v19 = vsel %vm128_vm2, %v125_v14, 0.0 }
 0x106   :  { %141 = vadd.xlane.f32.xlu1 %v140_v17 }
 0x107   :  { %v143_v20 = vsel %vm128_vm2, %v139_v18, 0.0 }
 0x108   :  { %133 = vadd.xlane.f32.xlu0 %v132_v19 }
 0x10a   :  { %144 = vadd.xlane.f32.xlu1 %v143_v20 }
 0x191   :  { %v131_v21 = vpop.xlane.xlu0 %130 }
 0x192   :  { %v136_v22 = vmul.f32 0.03125, %v131_v21 }
 0x193   :  { %v142_v23 = vpop.xlane.xlu1 %141 }
 0x194   :  { %v148_v24 = vmul.f32 %v136_v22, %v136_v22  ;;  %v146_v25 = vmul.f32 0.03125, %v142_v23  ;;  %v154_v37 = vsub.f32 %v124_v11, %v136_v22 }
 0x195   :  { %v134_v26 = vpop.xlane.xlu0 %133 }
 0x196   :  { %v150_v27 = vsub.f32 %v146_v25, %v148_v24  ;;  %v137_v28 = vmul.f32 0.03125, %v134_v26 }
 0x197   :  { %v145_v29 = vpop.xlane.xlu1 %144 }
 0x198   :  { %v152_v30 = vmax.f32 %v150_v27, 0.0  ;;  %v149_v31 = vmul.f32 %v137_v28, %v137_v28  ;;  %v147_v32 = vmul.f32 0.03125, %v145_v29  ;;  %v155_v42 = vsub.f32 %v125_v14, %v137_v28 }
 0x19a   :  { %v156_v33 = vadd.f32 1e-12, %v152_v30  ;;  %v151_v34 = vsub.f32 %v147_v32, %v149_v31 }
 0x19c   :  { %238 = vrsqrt.f32 %v156_v33  ;;  %v153_v35 = vmax.f32 %v151_v34, 0.0 }
 0x19e   :  { %v157_v36 = vadd.f32 1e-12, %v153_v35 }
 0x1a0   :  { %240 = vrsqrt.f32 %v157_v36 }
 0x1a6   :  { %v239_v38 = vpop.eup %238 }
 0x1a7   :  { %v160_v40 = vmul.f32 %v239_v38, %v154_v37 }
 0x1a9   :  { %v168_v43 = vmul.f32 %v211_v39, %v160_v40 }
 0x1aa   :  { %v241_v44 = vpop.eup %240 }
 0x1ab   :  { %v161_v45 = vmul.f32 %v241_v44, %v155_v42  ;;  %v176_v46 = vadd.f32 %v212_v41, %v168_v43 }
 0x1ad   :  { %v169_v47 = vmul.f32 %v211_v39, %v161_v45  ;;  %v215_v48 = vpack.c.bf16 %v176_v46, %v176_v46 }
 0x1af   :  { %v177_v49 = vadd.f32 %v212_v41, %v169_v47  ;;  %187 = vst.msk [vmem:[#allocation7] sm:$0xf] %vm186_vm3, %v215_v48 }
 0x1b1   :  { %v216_v50 = vpack.c.bf16 %v177_v49, %v177_v49 }
 0x1b3   :  { %188 = vst.msk [vmem:[#allocation7 + $0x4] sm:$0xf] %vm186_vm3, %v216_v50 }
 0x1b4   :  { %297 = shalt.err (!%p294_p6)
}
 0x1b5   :  { %s298_s30 = scalar_lea.hbm %s419_s6, 128 }
 0x1b6   :  { %p299_p7 = scmp.ne.s32.totalorder %s419_s6, %s298_s30  ;;  %p302_p8 = scmp.lt.u32.totalorder %s298_s30, %s419_s6 }
 0x1b8   :  { %p304_p9 = pnand %p302_p8, %p299_p7 }
 0x1ba   :  { %307 = shalt.err (!%p304_p9)
}
 0x1bb   :  { %200 = dma.vmem_to_hbm [thread:$0]  %s195_s28, 128, %s419_s6, [#allocation4], %s315_s7, %s315_s7, %s316_s8  }
 0x1bc   :  { %312 = dma.done.wait [#allocation4], 128  }
 0x1bd   :  { %313 = vsyncadd [#allocation4], 4294967168 }
 0x1be   :  { %204 = vsyncpa [#allocation3], 1 }
 0x1bf   :  { %205 = vsyncpa [#allocation6], 1 }
 0x1c0   :  { %206 = vsyncpa [#allocation4], 1 }

</bundles_post_ra>
